<compile_context>
chip_gen: v7x
topology: tpu7x:2x2x1
jax: 0.10.0
libtpu: 0.0.40
codegen_flags: <defaults>
</compile_context>

<pallas_src>
import math

import jax
import jax.numpy as jnp
from jax import lax
from jax.experimental import pallas as pl
from jax.experimental.pallas import tpu as pltpu


def _gelu_exact(x):
    # torch.nn.functional.gelu default = exact erf-based GELU
    return 0.5 * x * (1.0 + lax.erf(x / math.sqrt(2.0)))


def _round_up(x, m):
    return -(-x // m) * m


def adapter_kernel(h_ref, wd_ref, bd_ref, wu_ref, bu_ref, o_ref):
    h = h_ref[...]                                   # (TN, H), f32
    mdt = wd_ref.dtype                               # matmul input dtype (f32 or bf16)

    # Down projection: h @ W_down^T  (W_down pre-transposed to (H, A_pad))
    x = jnp.dot(h.astype(mdt), wd_ref[...], preferred_element_type=jnp.float32)
    x = x + bd_ref[...]                              # (1, A_pad) broadcast, f32
    x = _gelu_exact(x)

    # Up projection: x @ W_up^T  (W_up pre-transposed to (A_pad, H))
    y = jnp.dot(x.astype(mdt), wu_ref[...], preferred_element_type=jnp.float32)
    y = y + bu_ref[...] + h                          # bias + residual, f32
    o_ref[...] = y.astype(o_ref.dtype)


def adapter_forward(hidden_states, weight_down, bias_down, weight_up, bias_up,
                    *, tile_n=None, matmul_dtype=None):
    """hidden_states: [B, S, H] float32.  Returns same shape.

    weight_down: (A, H), bias_down: (A,), weight_up: (H, A), bias_up: (H,)
    matmul_dtype: optional dtype (e.g. jnp.bfloat16) for the MXU inputs;
                  accumulation, bias, GELU and residual stay in f32.
    """
    B, S, H = hidden_states.shape
    A = weight_down.shape[0]
    N = B * S
    out_dtype = hidden_states.dtype

    w_dtype = matmul_dtype if matmul_dtype is not None else weight_down.dtype

    # --- Host-side layout plumbing (done once, loop-invariant) -------------
    # Pad adapter dim to a lane-friendly multiple of 128 with zeros.
    A_pad = max(128, _round_up(A, 128))
    wd_t = jnp.zeros((H, A_pad), dtype=w_dtype).at[:, :A].set(
        weight_down.T.astype(w_dtype))
    wu_t = jnp.zeros((A_pad, H), dtype=w_dtype).at[:A, :].set(
        weight_up.T.astype(w_dtype))
    bd2 = jnp.zeros((1, A_pad), dtype=jnp.float32).at[0, :A].set(
        bias_down.astype(jnp.float32))
    bu2 = bias_up.astype(jnp.float32).reshape(1, H)

    # --- Row tile selection -------------------------------------------------
    # 2 in + 2 out double-buffered f32 tiles must stay well under scoped VMEM
    # on every generation (v5e default 16 MiB scoped); cap at 1024 rows.
    if tile_n is None:
        budget = 12 * 1024 * 1024
        t = budget // (4 * H * 4)
        tile_n = max(8, min(1024, (t // 8) * 8))
    tile_n = max(8, (tile_n // 8) * 8)                 # f32 sublane multiple
    tile_n = min(tile_n, max(8, _round_up(N, 8)))      # don't over-pad tiny N

    N_pad = _round_up(N, tile_n)
    h2d = hidden_states.reshape(N, H)
    if N_pad != N:
        h2d = jnp.pad(h2d, ((0, N_pad - N), (0, 0)))

    grid = (N_pad // tile_n,)

    out2d = pl.pallas_call(
        adapter_kernel,
        out_shape=jax.ShapeDtypeStruct((N_pad, H), out_dtype),
        grid_spec=pltpu.PrefetchScalarGridSpec(
            num_scalar_prefetch=0,
            grid=grid,
            in_specs=[
                pl.BlockSpec((tile_n, H), lambda i: (i, 0)),   # hidden rows
                pl.BlockSpec((H, A_pad), lambda i: (0, 0)),    # W_down^T (resident)
                pl.BlockSpec((1, A_pad), lambda i: (0, 0)),    # b_down
                pl.BlockSpec((A_pad, H), lambda i: (0, 0)),    # W_up^T (resident)
                pl.BlockSpec((1, H), lambda i: (0, 0)),        # b_up
            ],
            out_specs=pl.BlockSpec((tile_n, H), lambda i: (i, 0)),
        ),
        compiler_params=pltpu.CompilerParams(
            dimension_semantics=("parallel",),
            vmem_limit_bytes=64 * 1024 * 1024),
        input_output_aliases={0: 0},
    )(h2d, wd_t, bd2, wu_t, bu2)

    return out2d[:N].reshape(B, S, H)


def adapter_reference(hidden_states, weight_down, bias_down, weight_up, bias_up):
    x = hidden_states @ weight_down.T + bias_down
    x = 0.5 * x * (1.0 + lax.erf(x / math.sqrt(2.0)))
    x = x @ weight_up.T + bias_up
    return x + hidden_states


if __name__ == "__main__":
    # Small, deterministic setup consistent with the module's __init__.
    B, S = 2, 8           # batch, seq
    H = 32                # in_features
    A = 16                # adapter_size

    key = jax.random.PRNGKey(0)
    k_h, k_wd, k_wu = jax.random.split(key, 3)

    hidden_states = jax.random.normal(k_h, (B, S, H), dtype=jnp.float32)
    # reset_parameters(): normal std=0.001 for both weights, zero biases.
    weight_down = 0.001 * jax.random.normal(k_wd, (A, H), dtype=jnp.float32)
    weight_up = 0.001 * jax.random.normal(k_wu, (H, A), dtype=jnp.float32)
    bias_down = jnp.zeros((A,), dtype=jnp.float32)
    bias_up = jnp.zeros((H,), dtype=jnp.float32)

    out = adapter_forward(hidden_states, weight_down, bias_down,
                          weight_up, bias_up)
    out = jax.block_until_ready(out)

    ref = adapter_reference(hidden_states, weight_down, bias_down,
                            weight_up, bias_up)
    assert out.shape == hidden_states.shape
    assert jnp.allclose(out, ref, atol=1e-5, rtol=1e-5), "mismatch vs reference"

    print("KERNEL_OK")
</pallas_src>

<mosaic_0001>
module attributes {stable_mosaic.version = 11 : i64} {
  func.func @adapter_kernel(%arg0: i32, %arg1: memref<16x32xf32, #tpu.memory_space<vmem>>, %arg2: memref<32x128xf32, #tpu.memory_space<vmem>>, %arg3: memref<1x128xf32, #tpu.memory_space<vmem>>, %arg4: memref<128x32xf32, #tpu.memory_space<vmem>>, %arg5: memref<1x32xf32, #tpu.memory_space<vmem>>, %arg6: memref<16x32xf32, #tpu.memory_space<vmem>>) attributes {dimension_semantics = [#tpu.dimension_semantics<parallel>], iteration_bounds = array<i64: 1>, scalar_prefetch = 0 : i64, scratch_operands = 0 : i64, tpu.core_type = #tpu.core_type<tc>, window_params = [{transform_indices = @transform_0, window_bounds = array<i64: 16, 32>}, {pipeline_mode = #tpu.pipeline_mode<synchronous>, transform_indices = @transform_1, window_bounds = array<i64: 32, 128>}, {pipeline_mode = #tpu.pipeline_mode<synchronous>, transform_indices = @transform_2, window_bounds = array<i64: 1, 128>}, {pipeline_mode = #tpu.pipeline_mode<synchronous>, transform_indices = @transform_3, window_bounds = array<i64: 128, 32>}, {pipeline_mode = #tpu.pipeline_mode<synchronous>, transform_indices = @transform_4, window_bounds = array<i64: 1, 32>}, {transform_indices = @transform_5, window_bounds = array<i64: 16, 32>}]} {
    %c0 = arith.constant 0 : index
    %c0_0 = arith.constant 0 : index
    %0 = vector.load %arg1[%c0, %c0_0] : memref<16x32xf32, #tpu.memory_space<vmem>>, vector<16x32xf32>
    %c0_1 = arith.constant 0 : index
    %c0_2 = arith.constant 0 : index
    %1 = vector.load %arg2[%c0_1, %c0_2] : memref<32x128xf32, #tpu.memory_space<vmem>>, vector<32x128xf32>
    %cst = arith.constant dense<0.000000e+00> : vector<16x128xf32>
    %2 = tpu.matmul %0, %1, %cst {dimension_numbers = #tpu.dot_dimension_numbers<[1], [0], [0], [1], [0, 0, 1, 1], [], []>} : vector<16x32xf32>, vector<32x128xf32>, vector<16x128xf32> -> vector<16x128xf32>
    %c0_3 = arith.constant 0 : index
    %c0_4 = arith.constant 0 : index
    %3 = vector.load %arg3[%c0_3, %c0_4] : memref<1x128xf32, #tpu.memory_space<vmem>>, vector<1x128xf32>
    %4 = vector.broadcast %3 : vector<1x128xf32> to vector<16x128xf32>
    %5 = arith.addf %2, %4 : vector<16x128xf32>
    %cst_5 = arith.constant 5.000000e-01 : f32
    %6 = vector.broadcast %cst_5 : f32 to vector<16x128xf32>
    %7 = arith.mulf %6, %5 : vector<16x128xf32>
    %cst_6 = arith.constant 1.41421354 : f32
    %8 = vector.broadcast %cst_6 : f32 to vector<16x128xf32>
    %9 = arith.divf %5, %8 : vector<16x128xf32>
    %10 = math.erf %9 : vector<16x128xf32>
    %cst_7 = arith.constant 1.000000e+00 : f32
    %11 = vector.broadcast %cst_7 : f32 to vector<16x128xf32>
    %12 = arith.addf %11, %10 : vector<16x128xf32>
    %13 = arith.mulf %7, %12 : vector<16x128xf32>
    %c0_8 = arith.constant 0 : index
    %c0_9 = arith.constant 0 : index
    %14 = vector.load %arg4[%c0_8, %c0_9] : memref<128x32xf32, #tpu.memory_space<vmem>>, vector<128x32xf32>
    %cst_10 = arith.constant dense<0.000000e+00> : vector<16x32xf32>
    %15 = tpu.matmul %13, %14, %cst_10 {dimension_numbers = #tpu.dot_dimension_numbers<[1], [0], [0], [1], [0, 0, 1, 1], [], []>} : vector<16x128xf32>, vector<128x32xf32>, vector<16x32xf32> -> vector<16x32xf32>
    %c0_11 = arith.constant 0 : index
    %c0_12 = arith.constant 0 : index
    %16 = vector.load %arg5[%c0_11, %c0_12] : memref<1x32xf32, #tpu.memory_space<vmem>>, vector<1x32xf32>
    %17 = vector.broadcast %16 : vector<1x32xf32> to vector<16x32xf32>
    %18 = arith.addf %15, %17 : vector<16x32xf32>
    %19 = arith.addf %18, %0 : vector<16x32xf32>
    %c0_13 = arith.constant 0 : index
    %c0_14 = arith.constant 0 : index
    %20 = vector.load %arg6[%c0_13, %c0_14] : memref<16x32xf32, #tpu.memory_space<vmem>>, vector<16x32xf32>
    tpu.vector_store %arg6[%c0_13, %c0_14], %19 {strides = array<i32>} : memref<16x32xf32, #tpu.memory_space<vmem>>, vector<16x32xf32>,
    return
  }
  func.func @transform_0(%arg0: i32) -> (i32, i32) {
    %c0_i32 = arith.constant 0 : i32
    %c0_i32_0 = arith.constant 0 : i32
    return %arg0, %c0_i32 : i32, i32
  }
  func.func @transform_1(%arg0: i32) -> (i32, i32) {
    %c0_i32 = arith.constant 0 : i32
    %c0_i32_0 = arith.constant 0 : i32
    %c0_i32_1 = arith.constant 0 : i32
    return %c0_i32, %c0_i32_0 : i32, i32
  }
  func.func @transform_2(%arg0: i32) -> (i32, i32) {
    %c0_i32 = arith.constant 0 : i32
    %c0_i32_0 = arith.constant 0 : i32
    %c0_i32_1 = arith.constant 0 : i32
    return %c0_i32, %c0_i32_0 : i32, i32
  }
  func.func @transform_3(%arg0: i32) -> (i32, i32) {
    %c0_i32 = arith.constant 0 : i32
    %c0_i32_0 = arith.constant 0 : i32
    %c0_i32_1 = arith.constant 0 : i32
    return %c0_i32, %c0_i32_0 : i32, i32
  }
  func.func @transform_4(%arg0: i32) -> (i32, i32) {
    %c0_i32 = arith.constant 0 : i32
    %c0_i32_0 = arith.constant 0 : i32
    %c0_i32_1 = arith.constant 0 : i32
    return %c0_i32, %c0_i32_0 : i32, i32
  }
  func.func @transform_5(%arg0: i32) -> (i32, i32) {
    %c0_i32 = arith.constant 0 : i32
    %c0_i32_0 = arith.constant 0 : i32
    return %arg0, %c0_i32 : i32, i32
  }
}

</mosaic_0001>

<bundles_post_ra>
// kernel: tpu_custom_call.1
= control target key start
LH: loop header
LB: loop body
LE: loop exit
PB: predicated region body
PF: predicated region fallthrough
CT: control target
= control target key end

     0   :  { %10 = vsyncpa [#allocation3], 0  ;;  %s715_s0 = inlined_call_operand.hbm [shape: f32[16,32], index: 0, kind: input, shape index: {}, may-alias: {0,5}]   ;;  %s716_s1 = inlined_call_operand.hbm [shape: f32[32,128], index: 1, kind: input, shape index: {}]   ;;  %s717_s2 = inlined_call_operand.hbm [shape: f32[1,128], index: 2, kind: input, shape index: {}]   ;;  %s718_s3 = inlined_call_operand.hbm [shape: f32[128,32], index: 3, kind: input, shape index: {}]   ;;  %s719_s4 = inlined_call_operand.hbm [shape: f32[1,32], index: 4, kind: input, shape index: {}]   ;;  %s720_s5 = inlined_call_operand.hbm [shape: f32[16,32], index: 5, kind: output, shape index: {}, may-alias: {0,5}]  }
   0x1   :  { %11 = vsyncpa [#allocation6], 0 }
   0x2   :  { %12 = vsyncpa [#allocation9], 0 }
   0x3   :  { %13 = vsyncpa [#allocation4], 0  ;;  %s578_s18 = smov [#allocation5]   ;;  %s579_s20 = smov [#allocation8]  }
   0x4   :  { %s31_s19 = sshll.u32 %s578_s18, 4  ;;  %s53_s21 = sshll.u32 %s579_s20, 4  ;;  %s32_s19 = int_to_ptr.vmem [resolvable:$true] %s31_s19  ;;  %s616_s21 = int_to_ptr.vmem [resolvable:$true] %s53_s21 }
   0x5   :  { %s438_s24 = scalar_lea.hbm %s716_s1, 512 }
   0x6   :  { %p439_p0 = scmp.ne.s32.totalorder %s716_s1, %s438_s24  ;;  %p442_p1 = scmp.lt.u32.totalorder %s438_s24, %s716_s1 }
   0x8   :  { %p444_p2 = pnand %p442_p1, %p439_p0 }
   0xa   :  { %447 = shalt.err (!%p444_p2)
}
   0xb   :  { %s448_s29 = scalar_lea.vmem %s32_s19, 512  ;;  %p453_p4 = scmp.lt.s32.totalorder %s32_s19, %s32_s19 }
   0xc   :  { %p449_p3 = scmp.ne.s32.totalorder %s32_s19, %s448_s29  ;;  %p454_p5 = scmp.lt.s32.totalorder %s448_s29, %s448_s29 }
   0xe   :  { %p455_p6 = por %p454_p5, %p453_p4 }
  0x10   :  { %p456_p7 = pnand %p455_p6, %p449_p3 }
  0x12   :  { %459 = shalt.err (!%p456_p7)
}
  0x13   :  { %s580_s30 = smov 128   ;;  %s581_s6 = smov 8  }
  0x14   :  { %37 = dma.hbm_to_vmem [thread:$0]  %s716_s1, 512, %s32_s19, [#allocation6], %s580_s30, %s580_s30, %s581_s6  }
  0x15   :  { %s460_s11 = scalar_lea.hbm %s718_s3, 2048 }
  0x16   :  { %p461_p8 = scmp.ne.s32.totalorder %s718_s3, %s460_s11  ;;  %p464_p9 = scmp.lt.u32.totalorder %s460_s11, %s718_s3 }
  0x18   :  { %p466_p10 = pnand %p464_p9, %p461_p8 }
  0x1a   :  { %469 = shalt.err (!%p466_p10)
}
  0x1b   :  { %s470_s16 = scalar_lea.vmem %s616_s21, 2048  ;;  %p475_p12 = scmp.lt.s32.totalorder %s616_s21, %s616_s21 }
  0x1c   :  { %p471_p11 = scmp.ne.s32.totalorder %s616_s21, %s470_s16  ;;  %p476_p13 = scmp.lt.s32.totalorder %s470_s16, %s470_s16 }
  0x1e   :  { %p477_p0 = por %p476_p13, %p475_p12 }
  0x20   :  { %p478_p1 = pnand %p477_p0, %p471_p11 }
  0x22   :  { %481 = shalt.err (!%p478_p1)
}
  0x23   :  { %59 = dma.hbm_to_vmem [thread:$0]  %s718_s3, 2048, %s616_s21, [#allocation9], %s580_s30, %s580_s30, %s581_s6  }
  0x24   :  { %s582_s18 = smov [#allocation2]   ;;  %s583_s20 = smov [#allocation7]  }
  0x25   :  { %s19_s19 = sshll.u32 %s582_s18, 4  ;;  %s44_s22 = sshll.u32 %s583_s20, 4  ;;  %s20_s19 = int_to_ptr.vmem [resolvable:$true] %s19_s19  ;;  %s45_s22 = int_to_ptr.vmem [resolvable:$true] %s44_s22 }
  0x26   :  { %s482_s25 = scalar_lea.hbm %s715_s0, 256 }
  0x27   :  { %p483_p2 = scmp.ne.s32.totalorder %s715_s0, %s482_s25  ;;  %p486_p3 = scmp.lt.u32.totalorder %s482_s25, %s715_s0 }
  0x29   :  { %p488_p4 = pnand %p486_p3, %p483_p2 }
  0x2b   :  { %491 = shalt.err (!%p488_p4)
}
  0x2c   :  { %s492_s3 = scalar_lea.vmem %s20_s19, 256  ;;  %p497_p6 = scmp.lt.s32.totalorder %s20_s19, %s20_s19 }
  0x2d   :  { %p493_p5 = scmp.ne.s32.totalorder %s20_s19, %s492_s3  ;;  %p498_p7 = scmp.lt.s32.totalorder %s492_s3, %s492_s3 }
  0x2f   :  { %p499_p8 = por %p498_p7, %p497_p6 }
  0x31   :  { %p500_p9 = pnand %p499_p8, %p493_p5 }
  0x33   :  { %503 = shalt.err (!%p500_p9)
}
  0x34   :  { %25 = dma.hbm_to_vmem [thread:$0]  %s715_s0, 256, %s20_s19, [#allocation3], %s580_s30, %s580_s30, %s581_s6  }
  0x35   :  { %s504_s10 = scalar_lea.hbm %s717_s2, 16 }
  0x36   :  { %p505_p10 = scmp.ne.s32.totalorder %s717_s2, %s504_s10  ;;  %p508_p11 = scmp.lt.u32.totalorder %s504_s10, %s717_s2 }
  0x38   :  { %p510_p12 = pnand %p508_p11, %p505_p10 }
  0x3a   :  { %513 = shalt.err (!%p510_p12)
}
  0x3b   :  { %s514_s15 = scalar_lea.vmem %s45_s22, 16  ;;  %s518_s16 = scalar_lea.vmem %s45_s22, 32 }
  0x3c   :  { %p515_p13 = scmp.ne.s32.totalorder %s45_s22, %s514_s15  ;;  %p519_p0 = scmp.lt.s32.totalorder %s45_s22, %s45_s22 }
  0x3d   :  { %p520_p1 = scmp.lt.s32.totalorder %s518_s16, %s514_s15 }
  0x3f   :  { %p521_p2 = por %p520_p1, %p519_p0 }
  0x41   :  { %p522_p3 = pnand %p521_p2, %p515_p13 }
  0x43   :  { %525 = shalt.err (!%p522_p3)
}
  0x44   :  { %47 = dma.hbm_to_vmem [thread:$0]  %s717_s2, 16, %s45_s22, [#allocation6]  }
  0x45   :  { %s584_s17 = smov [#allocation10]   ;;  %s526_s23 = scalar_lea.hbm %s719_s4, 16 }
  0x46   :  { %s66_s18 = sshll.u32 %s584_s17, 4  ;;  %p527_p4 = scmp.ne.s32.totalorder %s719_s4, %s526_s23  ;;  %s67_s18 = int_to_ptr.vmem [resolvable:$true] %s66_s18 }
  0x47   :  { %p530_p5 = scmp.lt.u32.totalorder %s526_s23, %s719_s4 }
  0x49   :  { %p532_p6 = pnand %p530_p5, %p527_p4 }
  0x4b   :  { %535 = shalt.err (!%p532_p6)
}
  0x4c   :  { %s536_s28 = scalar_lea.vmem %s67_s18, 16  ;;  %s540_s2 = scalar_lea.vmem %s67_s18, 32 }
  0x4d   :  { %p537_p7 = scmp.ne.s32.totalorder %s67_s18, %s536_s28  ;;  %p541_p8 = scmp.lt.s32.totalorder %s67_s18, %s67_s18 }
  0x4e   :  { %p542_p9 = scmp.lt.s32.totalorder %s540_s2, %s536_s28 }
  0x50   :  { %p543_p10 = por %p542_p9, %p541_p8 }
  0x52   :  { %p544_p11 = pnand %p543_p10, %p537_p7 }
  0x54   :  { %547 = shalt.err (!%p544_p11)
}
  0x55   :  { %69 = dma.hbm_to_vmem [thread:$0]  %s719_s4, 16, %s67_s18, [#allocation9]  }
  0x56   :  { %570 = dma.done.wait [#allocation3], 256  }
  0x57   :  { %571 = vsyncadd [#allocation3], 4294967040 }
  0x58   :  { %572 = dma.done.wait [#allocation6], 528  }
  0x59   :  { %573 = vsyncadd [#allocation6], 4294966768 }
  0x5a   :  { %574 = dma.done.wait [#allocation9], 2064  }
  0x5b   :  { %575 = vsyncadd [#allocation9], 4294965232  ;;  %vm98_vm0 = vcmask 261120   ;;  %v87_v0 = vld [vmem:[#allocation5] sm:$0xff]  ;;  %v88_v1 = vld [vmem:[#allocation5 + $0x8] sm:$0xff]  ;;  %s585_s4 = smov [#allocation11]  }
  0x5c   :  { %v89_v2 = vld [vmem:[#allocation5 + $0x10] sm:$0xff]  ;;  %v386_v3 = vpack.c.bf16 %v88_v1, %v87_v0  ;;  %v90_v4 = vld [vmem:[#allocation5 + $0x18] sm:$0xff]  ;;  %v191_v7 = vld [vmem:[#allocation8] sm:$0xff]  ;;  %s298_s3 = sshll.u32 %s585_s4, 4  ;;  %s299_s3 = int_to_ptr.vmem [resolvable:$true] %s298_s3 }
  0x5d   :  { %v692_v5 = vld [vmem:[#allocation2] sm:$0xff]  ;;  %v390_v6 = vpack.c.bf16 %v90_v4, %v89_v2  ;;  %v194_v11 = vld [vmem:[#allocation8 + $0x18] sm:$0xff]  ;;  %v195_v13 = vld [vmem:[#allocation8 + $0x20] sm:$0xff]  ;;  %s548_s21 = scalar_lea.vmem %s299_s3, 256  ;;  %p553_p13 = scmp.lt.s32.totalorder %s299_s3, %s299_s3 }
  0x5e   :  { %348 = vmatprep.mubr.msk.f32.mxu0 %vm98_vm0, %v692_v5  ;;  %v192_v8 = vld [vmem:[#allocation8 + $0x8] sm:$0xff]  ;;  %v193_v9 = vld [vmem:[#allocation8 + $0x10] sm:$0xff]  ;;  %387 = vmatprep.subr.bf16.mxu0 %v386_v3  ;;  %v198_v18 = vld [vmem:[#allocation8 + $0x38] sm:$0xff]  ;;  %p549_p12 = scmp.ne.s32.totalorder %s299_s3, %s548_s21  ;;  %p554_p0 = scmp.lt.s32.totalorder %s548_s21, %s548_s21 }
  0x5f   :  { %v394_v10 = vpack.c.bf16 %v192_v8, %v191_v7  ;;  %389 = vmatpush3.bf16.msra.mxu0 %v386_v3  ;;  %v398_v12 = vpack.c.bf16 %v194_v11, %v193_v9  ;;  %v196_v14 = vld [vmem:[#allocation8 + $0x28] sm:$0xff]  ;;  %v86_v16 = vld [vmem:[#allocation2 + $0x8] sm:$0xff]  ;;  %v199_v20 = vld [vmem:[#allocation8 + $0x40] sm:$0xff] }
  0x60   :  { %391 = vmatprep.subr.bf16.mxu0 %v390_v6  ;;  %v402_v15 = vpack.c.bf16 %v196_v14, %v195_v13  ;;  %v197_v17 = vld [vmem:[#allocation8 + $0x30] sm:$0xff]  ;;  %v200_v21 = vld [vmem:[#allocation8 + $0x48] sm:$0xff]  ;;  %v202_v24 = vld [vmem:[#allocation8 + $0x58] sm:$0xff]  ;;  %p555_p1 = por %p554_p0, %p553_p13 }
  0x61   :  { %395 = vmatprep.subr.bf16.mxu1 %v394_v10  ;;  %v406_v19 = vpack.c.bf16 %v198_v18, %v197_v17  ;;  %v410_v22 = vpack.c.bf16 %v200_v21, %v199_v20  ;;  %v201_v23 = vld [vmem:[#allocation8 + $0x50] sm:$0xff]  ;;  %v203_v26 = vld [vmem:[#allocation8 + $0x60] sm:$0xff]  ;;  %v204_v27 = vld [vmem:[#allocation8 + $0x68] sm:$0xff] }
  0x62   :  { %397 = vmatpush3.bf16.msra.mxu1 %v394_v10  ;;  %v414_v25 = vpack.c.bf16 %v202_v24, %v201_v23  ;;  %v418_v28 = vpack.c.bf16 %v204_v27, %v203_v26  ;;  %v205_v29 = vld [vmem:[#allocation8 + $0x70] sm:$0xff]  ;;  %v206_v30 = vld [vmem:[#allocation8 + $0x78] sm:$0xff]  ;;  %v315_v47 = vld [vmem:[#allocation10] ss:$0 sm:$0xff]  ;;  %p556_p2 = pnand %p555_p1, %p549_p12 }
  0x63   :  { %399 = vmatprep.subr.bf16.mxu1 %v398_v12  ;;  %393 = vmatpush3.bf16.msra.mxu0 %v390_v6  ;;  %v422_v31 = vpack.c.bf16 %v206_v30, %v205_v29  ;;  %v312_v32 = vld [vmem:[#allocation7] ss:$0 sm:$0xff] }
  0x66   :  { %401 = vmatpush3.bf16.msra.mxu1 %v398_v12  ;;  %349 = vmatmul.mubr.msk.f32.vlgmr.msra.gmra.mrb[0].mxu0 %vm98_vm0, %v86_v16 }
  0x67   :  { %403 = vmatprep.subr.bf16.mxu1 %v402_v15 }
  0x6a   :  { %405 = vmatpush3.bf16.msra.mxu1 %v402_v15 }
  0x6b   :  { %407 = vmatprep.subr.bf16.mxu1 %v406_v19 }
  0x6e   :  { %409 = vmatpush3.bf16.msra.mxu1 %v406_v19 }
  0x6f   :  { %411 = vmatprep.subr.bf16.mxu1 %v410_v22 }
  0x72   :  { %413 = vmatpush3.bf16.msra.mxu1 %v410_v22 }
  0x73   :  { %415 = vmatprep.subr.bf16.mxu1 %v414_v25 }
  0x76   :  { %417 = vmatpush3.bf16.msra.mxu1 %v414_v25 }
  0x77   :  { %419 = vmatprep.subr.bf16.mxu1 %v418_v28 }
  0x7a   :  { %421 = vmatpush3.bf16.msra.mxu1 %v418_v28 }
  0x7b   :  { %423 = vmatprep.subr.bf16.mxu1 %v422_v31 }
  0x7e   :  { %425 = vmatpush3.bf16.msra.mxu1 %v422_v31 }
 0x139   :  { %v350_v33 = vpop.f32.mrb[0].mxu0 }
 0x13a   :  { %v177_v34 = vadd.f32 %v350_v33, %v312_v32  ;;  %v171_v35 = vpop.f32.mrb[1].mxu0 }
 0x13b   :  { %v172_v36 = vadd.f32 %v312_v32, %v171_v35 }
 0x13c   :  { %v184_v37 = vmul.f32 0.70710677, %v177_v34  ;;  %v181_v44 = vmul.f32 0.5, %v177_v34 }
 0x13d   :  { %v183_v38 = vmul.f32 0.70710677, %v172_v36  ;;  %v180_v42 = vmul.f32 0.5, %v172_v36 }
 0x13e   :  { %434 = verf.f32 %v184_v37 }
 0x13f   :  { %436 = verf.f32 %v183_v38 }
 0x148   :  { %v435_v39 = vpop.eup %434 }
 0x149   :  { %v437_v40 = vpop.eup %436  ;;  %v188_v41 = vadd.f32 1.0, %v435_v39 }
 0x14a   :  { %v187_v43 = vadd.f32 1.0, %v437_v40 }
 0x14b   :  { %v190_v46 = vmul.f32 %v188_v41, %v181_v44 }
 0x14c   :  { %v189_v45 = vmul.f32 %v187_v43, %v180_v42 }
 0x14e   :  { %383 = vmatprep.mubr.f32.mxu1 %v189_v45 }
 0x14f   :  { %384 = vmatmul.mubr.f32.vlgmr.msra.gmra.mrb[0].mxu1 %v190_v46 }
 0x222   :  { %v385_v48 = vpop.f32.mrb[0].mxu1 }
 0x223   :  { %v286_v49 = vadd.f32 %v385_v48, %v315_v47  ;;  %v280_v50 = vpop.f32.mrb[1].mxu1 }
 0x224   :  { %v281_v51 = vadd.f32 %v315_v47, %v280_v50 }
 0x225   :  { %v290_v52 = vadd.f32 %v286_v49, %v86_v16 }
 0x226   :  { %v289_v53 = vadd.f32 %v281_v51, %v692_v5 }
 0x227   :  { %292 = vst.msk [vmem:[#allocation11 + $0x8] sm:$0xff] %vm98_vm0, %v290_v52 }
 0x228   :  { %291 = vst.msk [vmem:[#allocation11] sm:$0xff] %vm98_vm0, %v289_v53 }
 0x229   :  { %559 = shalt.err (!%p556_p2)
}
 0x22a   :  { %s560_s9 = scalar_lea.hbm %s720_s5, 256 }
 0x22b   :  { %p561_p3 = scmp.ne.s32.totalorder %s720_s5, %s560_s9  ;;  %p564_p4 = scmp.lt.u32.totalorder %s560_s9, %s720_s5 }
 0x22d   :  { %p566_p5 = pnand %p564_p4, %p561_p3 }
 0x22f   :  { %569 = shalt.err (!%p566_p5)
}
 0x230   :  { %304 = dma.vmem_to_hbm [thread:$0]  %s299_s3, 256, %s720_s5, [#allocation4], %s580_s30, %s580_s30, %s581_s6  }
 0x231   :  { %576 = dma.done.wait [#allocation4], 256  }
 0x232   :  { %577 = vsyncadd [#allocation4], 4294967040 }
 0x233   :  { %308 = vsyncpa [#allocation3], 1 }
 0x234   :  { %309 = vsyncpa [#allocation6], 1 }
 0x235   :  { %310 = vsyncpa [#allocation9], 1 }
 0x236   :  { %311 = vsyncpa [#allocation4], 1 }

</bundles_post_ra>
